<compile_context>
chip_gen: v5e
topology: v5e:2x2
jax: 0.10.0
libtpu: 0.0.40
codegen_flags: <defaults>
</compile_context>

<pallas_src>
import jax
import jax.numpy as jnp
from jax.experimental import pallas as pl
from jax.experimental.pallas import tpu as pltpu


def _round_up(n, m):
    return ((n + m - 1) // m) * m


def _gene_regressor_kernel(xt_ref, w1t_ref, b1_ref, w2t_ref, b2_ref, o_ref):
    # Hidden Linear on the MXU, batch on lanes:
    # (H, D) bf16 @ (D, tile_b) bf16 -> (H, tile_b) f32.
    z = jnp.dot(w1t_ref[...], xt_ref[...], preferred_element_type=jnp.float32)
    z = z + b1_ref[...]                        # (H, tile_b) + (H, 1), f32
    out = jnp.maximum(z, 0.0) + z              # ReLU + residual (res == z), f32 VPU
    # Final Linear (out_features = 1): tiny MXU matmul, lands lane-dense.
    y = jnp.dot(w2t_ref[...], out, preferred_element_type=jnp.float32)  # (1, tile_b)
    o_ref[...] = (y + b2_ref[0]).astype(o_ref.dtype)


def gene_expression_regressor(x, w1, b1, w2, b2, *, tile_b=32768):
    """x: (B, D); w1: (D, H); b1: (1, H) or (H,); w2: (H, 1) or (H,); b2: (1,).

    Returns (B, 1) float32."""
    B, D = x.shape
    H = w1.shape[1]

    # Lane tile over the batch: multiple of 128, capped near ceil(B/2) so the
    # grid has >= 2 steps whenever possible (keeps both v7x TensorCores busy).
    max_tile = max(128, _round_up(pl.cdiv(B, 2), 128))
    tile_b = max(128, _round_up(min(tile_b, max_tile), 128))
    grid = (pl.cdiv(B, tile_b),)

    # Single fused transpose+cast prep pass: x^T is (D, B) bf16, batch on lanes.
    xt = x.astype(jnp.bfloat16).T
    w1t = w1.astype(jnp.bfloat16).T                          # (H, D), VMEM-resident
    b1_col = jnp.reshape(b1, (H, 1)).astype(jnp.float32)     # (H, 1)
    w2t = jnp.reshape(w2, (1, H)).astype(jnp.float32)        # (1, H)
    b2_s = jnp.reshape(jnp.asarray(b2, jnp.float32), (1,))   # SMEM scalar

    y = pl.pallas_call(
        _gene_regressor_kernel,
        out_shape=jax.ShapeDtypeStruct((1, B), jnp.float32),
        grid=grid,
        in_specs=[
            # x^T streams lane-tile by lane-tile (double-buffered DMA).
            pl.BlockSpec((D, tile_b), lambda i: (0, i)),
            # Weights / biases: constant index_map -> stay VMEM-resident.
            pl.BlockSpec((H, D), lambda i: (0, 0)),
            pl.BlockSpec((H, 1), lambda i: (0, 0)),
            pl.BlockSpec((1, H), lambda i: (0, 0)),
            # Scalar final bias lives in SMEM.
            pl.BlockSpec(memory_space=pltpu.MemorySpace.SMEM),
        ],
        # Lane-dense (1, tile_b) output rows (unmasked stores except the tail).
        out_specs=pl.BlockSpec((1, tile_b), lambda i: (0, i)),
        compiler_params=pltpu.CompilerParams(
            dimension_semantics=("parallel",),       # megacore sharding on v7x
            vmem_limit_bytes=32 * 1024 * 1024,       # safe on v7x's 64 MiB VMEM
        ),
    )(xt, w1t, b1_col, w2t, b2_s)

    return y.reshape(B, 1)


def _reference(x, w1, b1, w2, b2):
    # Matches the kernel's numerics: bf16 inputs to the first matmul with f32
    # accumulation, f32 math afterwards.
    z = jnp.dot(x.astype(jnp.bfloat16), w1.astype(jnp.bfloat16),
                preferred_element_type=jnp.float32) + jnp.reshape(b1, (1, -1))
    out = jnp.maximum(z, 0.0) + z
    y = jnp.dot(out, jnp.reshape(w2, (-1, 1)).astype(jnp.float32),
                preferred_element_type=jnp.float32)
    return y + jnp.reshape(jnp.asarray(b2, jnp.float32), (1, 1))


if __name__ == "__main__":
    INPUT_DIM = 16
    HIDDEN = 32
    BATCH = 500   # not a multiple of 128 -> exercises the masked tail block + 2-step grid

    key = jax.random.PRNGKey(0)
    kx, kw1, kb1, kw2, kb2 = jax.random.split(key, 5)

    x = jax.random.normal(kx, (BATCH, INPUT_DIM), dtype=jnp.float32)

    # Synthetic parameters (mimic nn.Linear shapes, stored transposed as
    # (in, out) for the kernel layout).
    w1 = jax.random.normal(kw1, (INPUT_DIM, HIDDEN), dtype=jnp.float32) * 0.1
    b1 = jax.random.normal(kb1, (1, HIDDEN), dtype=jnp.float32) * 0.1
    w2 = jax.random.normal(kw2, (HIDDEN, 1), dtype=jnp.float32) * 0.1
    b2 = jax.random.normal(kb2, (1,), dtype=jnp.float32) * 0.1

    y = gene_expression_regressor(x, w1, b1, w2, b2)
    jax.block_until_ready(y)

    y_ref = _reference(x, w1, b1, w2, b2)
    assert y.shape == (BATCH, 1)
    max_err = float(jnp.max(jnp.abs(y - y_ref)))
    assert jnp.allclose(y, y_ref, atol=1e-2, rtol=1e-2), max_err

    print("KERNEL_OK")
</pallas_src>

<mosaic_0001>
module attributes {stable_mosaic.version = 11 : i64} {
  func.func @_gene_regressor_kernel(%arg0: i32, %arg1: memref<16x256xbf16, #tpu.memory_space<vmem>>, %arg2: memref<32x16xbf16, #tpu.memory_space<vmem>>, %arg3: memref<32x1xf32, #tpu.memory_space<vmem>>, %arg4: memref<1x32xf32, #tpu.memory_space<vmem>>, %arg5: memref<1xf32, #tpu.memory_space<smem>>, %arg6: memref<1x256xf32, #tpu.memory_space<vmem>>) attributes {dimension_semantics = [#tpu.dimension_semantics<parallel>], iteration_bounds = array<i64: 2>, scalar_prefetch = 0 : i64, scratch_operands = 0 : i64, tpu.core_type = #tpu.core_type<tc>, window_params = [{transform_indices = @transform_0, window_bounds = array<i64: 16, 256>}, {pipeline_mode = #tpu.pipeline_mode<synchronous>, transform_indices = @transform_1, window_bounds = array<i64: 32, 16>}, {pipeline_mode = #tpu.pipeline_mode<synchronous>, transform_indices = @transform_2, window_bounds = array<i64: 32, 1>}, {pipeline_mode = #tpu.pipeline_mode<synchronous>, transform_indices = @transform_3, window_bounds = array<i64: 1, 32>}, {transform_indices = @transform_4, window_bounds = array<i64: 1>}, {transform_indices = @transform_5, window_bounds = array<i64: 1, 256>}]} {
    %c0 = arith.constant 0 : index
    %c0_0 = arith.constant 0 : index
    %0 = vector.load %arg2[%c0, %c0_0] : memref<32x16xbf16, #tpu.memory_space<vmem>>, vector<32x16xbf16>
    %c0_1 = arith.constant 0 : index
    %c0_2 = arith.constant 0 : index
    %1 = vector.load %arg1[%c0_1, %c0_2] : memref<16x256xbf16, #tpu.memory_space<vmem>>, vector<16x256xbf16>
    %cst = arith.constant dense<0.000000e+00> : vector<32x256xf32>
    %2 = tpu.matmul %0, %1, %cst {dimension_numbers = #tpu.dot_dimension_numbers<[1], [0], [0], [1], [0, 0, 1, 1], [], []>} : vector<32x16xbf16>, vector<16x256xbf16>, vector<32x256xf32> -> vector<32x256xf32>
    %c0_3 = arith.constant 0 : index
    %c0_4 = arith.constant 0 : index
    %3 = vector.load %arg3[%c0_3, %c0_4] : memref<32x1xf32, #tpu.memory_space<vmem>>, vector<32x1xf32>
    %4 = vector.broadcast %3 : vector<32x1xf32> to vector<32x256xf32>
    %5 = arith.addf %2, %4 : vector<32x256xf32>
    %cst_5 = arith.constant 0.000000e+00 : f32
    %6 = vector.broadcast %cst_5 : f32 to vector<32x256xf32>
    %7 = arith.maximumf %5, %6 : vector<32x256xf32>
    %8 = arith.addf %7, %5 : vector<32x256xf32>
    %c0_6 = arith.constant 0 : index
    %c0_7 = arith.constant 0 : index
    %9 = vector.load %arg4[%c0_6, %c0_7] : memref<1x32xf32, #tpu.memory_space<vmem>>, vector<1x32xf32>
    %cst_8 = arith.constant dense<0.000000e+00> : vector<1x256xf32>
    %10 = tpu.matmul %9, %8, %cst_8 {dimension_numbers = #tpu.dot_dimension_numbers<[1], [0], [0], [1], [0, 0, 1, 1], [], []>} : vector<1x32xf32>, vector<32x256xf32>, vector<1x256xf32> -> vector<1x256xf32>
    %c0_9 = arith.constant 0 : index
    %11 = memref.load %arg5[%c0_9] : memref<1xf32, #tpu.memory_space<smem>>
    %12 = vector.broadcast %11 : f32 to vector<1x256xf32>
    %13 = arith.addf %10, %12 : vector<1x256xf32>
    %c0_10 = arith.constant 0 : index
    %c0_11 = arith.constant 0 : index
    %14 = vector.load %arg6[%c0_10, %c0_11] : memref<1x256xf32, #tpu.memory_space<vmem>>, vector<1x256xf32>
    tpu.vector_store %arg6[%c0_10, %c0_11], %13 {strides = array<i32>} : memref<1x256xf32, #tpu.memory_space<vmem>>, vector<1x256xf32>,
    return
  }
  func.func @transform_0(%arg0: i32) -> (i32, i32) {
    %c0_i32 = arith.constant 0 : i32
    %c0_i32_0 = arith.constant 0 : i32
    return %c0_i32, %arg0 : i32, i32
  }
  func.func @transform_1(%arg0: i32) -> (i32, i32) {
    %c0_i32 = arith.constant 0 : i32
    %c0_i32_0 = arith.constant 0 : i32
    %c0_i32_1 = arith.constant 0 : i32
    return %c0_i32, %c0_i32_0 : i32, i32
  }
  func.func @transform_2(%arg0: i32) -> (i32, i32) {
    %c0_i32 = arith.constant 0 : i32
    %c0_i32_0 = arith.constant 0 : i32
    %c0_i32_1 = arith.constant 0 : i32
    return %c0_i32, %c0_i32_0 : i32, i32
  }
  func.func @transform_3(%arg0: i32) -> (i32, i32) {
    %c0_i32 = arith.constant 0 : i32
    %c0_i32_0 = arith.constant 0 : i32
    %c0_i32_1 = arith.constant 0 : i32
    return %c0_i32, %c0_i32_0 : i32, i32
  }
  func.func @transform_4(%arg0: i32) -> i32 {
    %c0_i32 = arith.constant 0 : i32
    %c0_i32_0 = arith.constant 0 : i32
    return %c0_i32 : i32
  }
  func.func @transform_5(%arg0: i32) -> (i32, i32) {
    %c0_i32 = arith.constant 0 : i32
    %c0_i32_0 = arith.constant 0 : i32
    return %c0_i32, %arg0 : i32, i32
  }
}

</mosaic_0001>

<bundles_post_ra>
// kernel: tpu_custom_call.1
= control target key start
LH: loop header
LB: loop body
LE: loop exit
PB: predicated region body
PF: predicated region fallthrough
CT: control target
= control target key end

     0   :  { %s815_s0 = inlined_call_operand.vmem [shape: bf16[16,500], index: 0, kind: input, shape index: {}]   ;;  %s816_s1 = inlined_call_operand.vmem [shape: bf16[32,16], index: 1, kind: input, shape index: {}]   ;;  %s817_s2 = inlined_call_operand.vmem [shape: f32[32,1], index: 2, kind: input, shape index: {}]   ;;  %s818_s3 = inlined_call_operand.vmem [shape: f32[1,32], index: 3, kind: input, shape index: {}]   ;;  %s819_s4 = inlined_call_operand.<no memory space> [shape: f32[1], index: 4, kind: input, shape index: {}]   ;;  %s820_s5 = inlined_call_operand.hbm [shape: f32[1,500], index: 5, kind: output, shape index: {}]  }
   0x1   :  { %10 = sst [smem:[#allocation2]] %s819_s4 }
   0x2   :  { %11 = vsyncpa [#allocation5], 0 }
   0x3   :  { %13 = vsyncpa [#allocation5 + $0x1], 0  ;;  %s699_s20 = smov 0   ;;  %s701_s21 = smov 0  }
   0x4   :  { %s703_s22 = smov 0   ;;  %s705_s23 = smov 0  }
   0x5 LB: > { %s516_s4 = sadd.s32 4294967295, %s663_s23   ;;  %s517_s24 = sadd.s32 4294967294, %s663_s23   ;;  %s663_s23 = sphi %s705_s23, %s826_s23   ;;  %s659_s22 = sphi %s703_s22, %s825_s22   ;;  %s655_s21 = sphi %s701_s21, %s824_s21   ;;  %s651_s20 = sphi %s699_s20, %s823_s20  }
   0x6   : > { %s722_s25 = sadd.s32 1, %s663_s23   ;;  %s26_s26 = sadd.s32 1, %s659_s22 }
   0x7   : > { %s23_s27 = ssub.s32 %s663_s23, %s722_s25  ;;  %p33_p0 = scmp.ne.s32.totalorder %s659_s22, %s655_s21 }
   0x8   : > { %p24_p1 = scmp.eq.s32.totalorder %s23_s27, 0  ;;  %p34_p2 = scmp.eq.s32.totalorder %s663_s23, 0 }
   0x9   : > { %p147_p3 = scmp.eq.s32.totalorder %s516_s4, 1  ;;  %p152_p4 = scmp.ne.s32.totalorder %s655_s21, %s651_s20 }
   0xa   : > { %s735_s28 = scalar_select %p24_p1, %s659_s22, %s26_s26  }
   0xb   : > { %p35_p5 = por %p34_p2, %p33_p0  ;;  %p737_p6 = por %p147_p3, %p33_p0 }
   0xc   : > { %p153_p7 = scmp.eq.s32.totalorder %s517_s24, 1  ;;  %p519_p9 = scmp.ge.s32.totalorder %s663_s23, 2 }
   0xe   : > { %p741_p8 = por %p153_p7, %p152_p4  ;;  %181 = sbr.rel (%p519_p9) target bundleno = 25 (0x19), region = 32 }
  0x13   : > { %184 = sbr.rel (!%p35_p5) target bundleno = 25 (0x19), region = 36  ;;  %s186_s6 = sand.u32 (%p35_p5), 1, %s659_s22  }
  0x14   : > { %s552_s7 = sshll.u32 (%p35_p5), %s663_s23, 3  ;;  %s520_s8 = sshll.u32 (%p35_p5), %s186_s6, 4 }
  0x15   : > { %s191_s11 = scalar_lea.vmem (%p35_p5), %s815_s0, %s552_s7  ;;  %s188_s12 = scalar_lea.vmem (%p35_p5), [#allocation3], %s520_s8 }
  0x16   : > { %v222_v0 = vld [vmem:[%s191_s11] sm:$0xff] (%p35_p5)  ;;  %v224_v1 = vld [vmem:[%s191_s11 + $0x10] sm:$0xff] (%p35_p5) }
  0x17   : > { %223 = vst [vmem:[%s188_s12] sm:$0xff] (%p35_p5), %v222_v0 }
  0x18   : > { %225 = vst [vmem:[%s188_s12 + $0x8] sm:$0xff] %v224_v1 }
  0x19 PF: > { %p523_p10 = scmp.ge.s32.totalorder %s663_s23, 1  ;;  %p230_p11 = scmp.lt.s32.totalorder %s663_s23, 3 }
  0x1b   : > { %p231_p12 = pnand %p523_p10, %p230_p11 }
  0x1c   : > { %s756_s13 = sand.u32 (!%p231_p12), 1, %s655_s21   ;;  %s379_s14 = sld [smem:[#allocation2]] (!%p231_p12) }
  0x1d   : > { %234 = sbr.rel (%p231_p12) target bundleno = 335 (0x14f), region = 74  ;;  %s524_s16 = sshll.u32 (!%p231_p12), %s756_s13, 4 }
  0x1e   : > { %s239_s19 = scalar_lea.vmem (!%p231_p12), [#allocation3], %s524_s16  ;;  %s525_s15 = sshll.u32 (!%p231_p12), %s756_s13, 1 }
  0x1f   : > { %s549_s16 = sshll.u32 (!%p231_p12), %s516_s4, 1  ;;  %s263_s24 = scalar_lea.vmem (!%p231_p12), [#allocation4], %s525_s15 }
  0x20   : > { %s449_s26 = sshll.u32 (!%p231_p12), %s263_s24, 4  ;;  %s437_s4 = scalar_lea.sflag (!%p231_p12), [#allocation5], %s756_s13  ;;  %s450_s26 = int_to_ptr.vmem [resolvable:$true] %s449_s26 }
  0x21   : > { %s621_s10 = scalar_lea.hbm (!%p231_p12), %s820_s5, 4 }
  0x22   : > { %v276_v2 = vld [vmem:[%s817_s2 + $0x18] sm:$0xff]  ;;  %v665_v3 = vmov 0   ;;  %v274_v4 = vld [vmem:[%s817_s2 + $0x8] sm:$0xff]  ;;  %v536_v5 = vld [vmem:[%s239_s19] sm:$0xf]  ;;  %vm317_vm0 = vcmask 130048   ;;  %v380_v52 = vstv %s379_s14  ;;  %v431_v54 = vlaneseq }
  0x23   : > { %599 = vset.pattern.permute.xlu0 %v665_v3  ;;  %600 = vset.pattern.permute.xlu1 %v665_v3  ;;  %v556_v6 = vld [vmem:[%s239_s19 + $0x4] sm:$0xf0]  ;;  %v555_v7 = vld [vmem:[%s239_s19 + $0x4] sm:$0xf]  ;;  %v538_v9 = vld [vmem:[%s239_s19 + $0x8] sm:$0xf0]  ;;  %s447_s19 = scalar_lea.hbm %s820_s5, %s549_s16 }
  0x24   : > { %294 = vperm.xlu0 %599, %v276_v2   ;;  %284 = vperm.xlu1 %600, %v274_v4   ;;  %v537_v8 = vor.u32 %v556_v6, %v536_v5  ;;  %v541_v10 = vor.u32 %v555_v7, %v538_v9  ;;  %v554_v11 = vld [vmem:[%s816_s1 + $0x8] sm:$0xff]  ;;  %v553_v12 = vld [vmem:[%s816_s1] sm:$0xff]  ;;  %v275_v13 = vld [vmem:[%s817_s2 + $0x10] sm:$0xff]  ;;  %vm381_vm1 = vcmask 261120   ;;  %s451_s27 = sshll.u32 %s447_s19, 4  ;;  %vm428_vm2 = vcmask 1040384   ;;  %s452_s27 = int_to_ptr.hbm [resolvable:$true] %s451_s27 }
  0x25   : > { %v273_v14 = vld [vmem:[%s817_s2] sm:$0xff]  ;;  %vm433_vm3 = vcmp.lt.s32.totalorder %v431_v54, 256  ;;  %s615_s6 = sshra.s32 %s452_s27, 4  ;;  %s616_s6 = int_to_ptr.hbm [resolvable:$true] %s615_s6 }
  0x26   : > { %557 = vmatpush.bf16.msra.mxu2 %v537_v8  ;;  %331 = vmatpush.bf16.msra.mxu0 %v537_v8  ;;  %v378_v51 = vld [vmem:[%s818_s3] sm:$0x1]  ;;  %s617_s7 = scalar_lea.hbm %s616_s6, 2  ;;  %p622_p2 = scmp.lt.s32.totalorder %s616_s6, %s820_s5 }
  0x27   : > { %558 = vmatpush.bf16.msra.mxu3 %v541_v10  ;;  %350 = vmatpush.bf16.msra.mxu1 %v541_v10  ;;  %p618_p13 = scmp.ne.s32.totalorder %s616_s6, %s617_s7  ;;  %p623_p3 = scmp.lt.s32.totalorder %s621_s10, %s617_s7 }
  0x29   : > { %543 = vmatmul.msk.bf16.vlgmr.msra.gmra.mxu2 %vm317_vm0, %v554_v11  ;;  %542 = vmatmul.msk.bf16.vlgmr.msra.gmra.mxu0 %vm317_vm0, %v553_v12  ;;  %p619_p0 = pnand %p618_p13, %p737_p6  ;;  %p624_p4 = por %p623_p3, %p622_p2 }
  0x2a   : > { %545 = vmatmul.msk.bf16.vlgmr.msra.gmra.mxu3 %vm317_vm0, %v554_v11  ;;  %544 = vmatmul.msk.bf16.vlgmr.msra.gmra.mxu1 %vm317_vm0, %v553_v12 }
  0x2b   : > { %p620_p1 = pneg %p619_p0 }
  0x2c   : > { %289 = vperm.xlu0 %599, %v275_v13   ;;  %279 = vperm.xlu1 %600, %v273_v14  }
  0x2d   : > { %p625_p5 = pnand %p624_p4, %p620_p1 }
  0x96   : > { %v295_v15 = vpop.permute.xlu0 %294  ;;  %v285_v18 = vpop.permute.xlu1 %284 }
  0x9e   : > { %v290_v21 = vpop.permute.xlu0 %289  ;;  %v280_v27 = vpop.permute.xlu1 %279 }
  0xa6   : > { %v333_v16 = vpop.f32.mrf.mxu0 }
  0xa7   : > { %v352_v17 = vpop.f32.mrf.mxu1  ;;  %v334_v34 = vadd.f32 %v333_v16, %v280_v27 }
  0xa8   : > { %v353_v37 = vadd.f32 %v352_v17, %v280_v27 }
  0xa9   : > { %v362_v43 = vmax.f32 %v334_v34, 0.0 }
  0xaa   : > { %v363_v45 = vmax.f32 %v353_v37, 0.0 }
  0xab   : > { %v370_v49 = vadd.f32 %v362_v43, %v334_v34 }
  0xac   : > { %v338_v19 = vpop.f32.mrf.mxu2  ;;  %v371_v50 = vadd.f32 %v363_v45, %v353_v37 }
  0xad   : > { %v357_v20 = vpop.f32.mrf.mxu3  ;;  %v339_v23 = vadd.f32 %v338_v19, %v290_v21 }
  0xae   : > { %v335_v22 = vpop.f32.mrf.mxu0  ;;  %v358_v25 = vadd.f32 %v357_v20, %v290_v21 }
  0xaf   : > { %v354_v24 = vpop.f32.mrf.mxu1  ;;  %v336_v28 = vadd.f32 %v335_v22, %v285_v18  ;;  %v366_v33 = vmax.f32 %v339_v23, 0.0 }
  0xb0   : > { %v355_v31 = vadd.f32 %v354_v24, %v285_v18  ;;  %v367_v36 = vmax.f32 %v358_v25, 0.0 }
  0xb1   : > { %v364_v39 = vmax.f32 %v336_v28, 0.0  ;;  %v374_v44 = vadd.f32 %v366_v33, %v339_v23 }
  0xb2   : > { %v365_v41 = vmax.f32 %v355_v31, 0.0  ;;  %v375_v46 = vadd.f32 %v367_v36, %v358_v25 }
  0xb3   : > { %v372_v47 = vadd.f32 %v364_v39, %v336_v28 }
  0xb4   : > { %v340_v26 = vpop.f32.mrf.mxu2  ;;  %v373_v48 = vadd.f32 %v365_v41, %v355_v31 }
  0xb5   : > { %v341_v29 = vadd.f32 %v340_v26, %v295_v15  ;;  %v359_v30 = vpop.f32.mrf.mxu3 }
  0xb6   : > { %v360_v32 = vadd.f32 %v359_v30, %v295_v15 }
  0xb7   : > { %v368_v35 = vmax.f32 %v341_v29, 0.0 }
  0xb8   : > { %v369_v38 = vmax.f32 %v360_v32, 0.0 }
  0xb9   : > { %v376_v40 = vadd.f32 %v368_v35, %v341_v29 }
  0xba   : > { %v377_v42 = vadd.f32 %v369_v38, %v360_v32 }
  0xbb   : > { %397 = vmatpush.msrb.mxu2 %v376_v40 }
  0xbc   : > { %417 = vmatpush.msrb.mxu3 %v377_v42 }
  0xbd   : > { %398 = vmatpush.msrb.mxu2 %v374_v44 }
  0xbe   : > { %418 = vmatpush.msrb.mxu3 %v375_v46 }
  0xbf   : > { %399 = vmatpush.msrb.mxu2 %v372_v47 }
  0xc0   : > { %419 = vmatpush.msrb.mxu3 %v373_v48 }
  0xc1   : > { %400 = vmatpush.msrb.mxu2 %v370_v49 }
  0xc2   : > { %420 = vmatpush.msrb.mxu3 %v371_v50  ;;  %546 = vmatmul.msk.f32.vlgmr.msrb.gmra.mxu2 %vm381_vm1, %v378_v51 }
  0xc3   : > { %547 = vmatmul.msk.f32.vlgmr.msrb.gmra.mxu3 %vm381_vm1, %v378_v51 }
 0x145   : > { %v402_v53 = vpop.f32.mrf.mxu2 }
 0x146   : > { %v422_v55 = vpop.f32.mrf.mxu3  ;;  %v403_v57 = vadd.f32 %v402_v53, %v380_v52 }
 0x147   : > { %v423_v56 = vadd.f32 %v422_v55, %v380_v52 }
 0x149   : > { %v427_v58 = vrot.slane %v423_v56, 7 }
 0x14b   : > { %v429_v59 = vsel %vm428_vm2, %v403_v57, %v427_v58 }
 0x14c   : > { %435 = vst.msk [vmem:[%s263_s24] sm:$0x3] %vm433_vm3, %v429_v59 }
 0x14d   : > { %628 = shalt.err (!%p625_p5)
}
 0x14e   : > { %559 = dma.vmem_to_hbm [thread:$0]  (%p737_p6), %s450_s26, 32, %s452_s27, %s437_s4  }
 0x14f PF: > { %s463_s13 = sand.u32 1, %s651_s20   ;;  %p562_p7 = pnand %p519_p9, %p741_p8 }
 0x150   : > { %s464_s14 = scalar_lea.sflag [#allocation5], %s463_s13 }
 0x151   : > { %p563_p10 = pneg %p562_p7 }
 0x153   : > { %646 = dma.done.wait (%p563_p10), %s464_s14, 32  }
 0x154   : > { %648 = vsyncadd (%p563_p10), %s464_s14, 4294967264  ;;  %p16_p11 = scmp.ge.s32.totalorder %s722_s25, 4   ;;  %s823_s20 = smov %s655_s21 }
 0x155   : > { %s824_s21 = smov %s659_s22  ;;  %s825_s22 = smov %s735_s28 }
 0x156   : > { %s826_s23 = smov %s722_s25  ;;  %18 = sbr.rel (!%p16_p11) target bundleno = 5 (0x5), region = 118 }
 0x15b   :  { %470 = vsyncpa [#allocation5], 1 }
 0x15c   :  { %472 = vsyncpa [#allocation5 + $0x1], 1 }

</bundles_post_ra>
